<compile_context>
chip_gen: v6e
topology: v6e:2x2x1
jax: 0.10.0
libtpu: 0.0.40
codegen_flags: <defaults>
</compile_context>

<pallas_src>
import functools

import jax
import jax.numpy as jnp
from jax.experimental import pallas as pl
from jax.experimental.pallas import tpu as pltpu


def _round_up(x: int, m: int) -> int:
    return ((x + m - 1) // m) * m


def _fused_block_kernel(*refs, num_layers: int, apply_act, negative_slope: float,
                        precision):
    """Fused y = act(...act(x @ W0 + b0)... @ W_{L-1} + b_{L-1}) on one batch tile.

    refs = (x_ref, w0_ref, b0_ref, ..., w_{L-1}_ref, b_{L-1}_ref, o_ref)
    """
    x_ref = refs[0]
    o_ref = refs[-1]
    wb_refs = refs[1:-1]

    y = x_ref[...]
    for i in range(num_layers):
        w = wb_refs[2 * i][...]
        b = wb_refs[2 * i + 1][...]            # (1, Cout) broadcasts over rows
        # Cast activations to the (pre-cast) weight dtype; no-op when they match.
        y = jnp.dot(y.astype(w.dtype), w,
                    preferred_element_type=jnp.float32,
                    precision=precision)
        y = y + b.astype(jnp.float32)          # bias folded into f32 accumulator
        if apply_act[i]:
            if negative_slope == 0.0:
                y = jnp.maximum(y, 0.0)        # ReLU: single vmax
            else:
                y = jnp.where(y >= 0.0, y, negative_slope * y)
    o_ref[...] = y.astype(o_ref.dtype)


def prepare_linear_block_params(params, *, use_bf16=True):
    """Pad (zero, exact) and cast LinearBlock params ONCE, outside the forward.

    params: list of (w, b) with w: (Cin_i, Cout_i), b: (1, Cout_i) or (Cout_i,).
    Layer-0 input dim and last-layer output dim are kept un-padded (block dim
    == full array dim is always legal); hidden dims are padded to 128 lanes so
    intermediate activations / matmul operands are lane-dense.  Zero padding
    is exact (padded weight rows/cols and bias entries are zero).
    """
    num_layers = len(params)
    w_dtype = jnp.bfloat16 if use_bf16 else jnp.float32
    dims = [params[0][0].shape[0]] + [w.shape[1] for w, _ in params]
    p = [dims[0]] + [_round_up(d, 128) for d in dims[1:-1]] + [dims[-1]]

    prepared = []
    for i, (w, b) in enumerate(params):
        ci, co = w.shape
        ci_p, co_p = p[i], p[i + 1]
        w_p = jnp.zeros((ci_p, co_p), w_dtype).at[:ci, :co].set(w.astype(w_dtype))
        b_p = jnp.zeros((1, co_p), jnp.float32).at[:, :co].set(
            jnp.asarray(b).reshape(1, co).astype(jnp.float32))
        prepared.append((w_p, b_p))
    return prepared


def linear_block_forward(x, params, *, last_linear=False, leaky=True,
                         negative_slope=0.01, batch_norm=False, dropout=0.0,
                         use_bf16_mxu=True, params_prepared=False,
                         precision=None, tile_m_max=512,
                         vmem_budget_bytes=32 * 1024 * 1024,
                         single_buffer_weights=True):
    """Equivalent of LinearBlock.forward (batch_norm=False, dropout=0 path).

    x:      (N, Cin) float array.
    params: list of (w, b) — raw, or pre-padded via prepare_linear_block_params
            (pass params_prepared=True to skip the per-call padding pass).
    """
    if batch_norm or dropout > 0.0:
        raise NotImplementedError(
            "batch_norm / dropout paths of LinearBlock are not implemented")

    n, c_in = x.shape
    num_layers = len(params)
    slope = float(negative_slope) if leaky else 0.0
    apply_act = tuple(
        not (last_linear and (i + 1 >= num_layers)) for i in range(num_layers))

    prepared = params if params_prepared else prepare_linear_block_params(
        params, use_bf16=use_bf16_mxu)
    flat_wb = [a for pair in prepared for a in pair]
    assert prepared[0][0].shape[0] == c_in, "x feature dim mismatch vs layer 0"
    c_out = prepared[-1][0].shape[1]

    # ---- VMEM budget: resident weights + double-buffered in/out tiles + acts ----
    wb_factor = 1 if single_buffer_weights else 2
    wb_bytes = sum(int(a.size) * a.dtype.itemsize for a in flat_wb) * wb_factor
    if wb_bytes > vmem_budget_bytes:
        # TODO(synk): add an output-feature (N) tiling path for layers whose
        # weights do not fit VMEM; fail loudly instead of a Mosaic VMEM OOM.
        raise NotImplementedError(
            f"resident weights ({wb_bytes} B) exceed VMEM budget "
            f"({vmem_budget_bytes} B); output-feature tiling not implemented")

    widest = max([c_in] + [w.shape[1] for w, _ in prepared])
    x_item = jnp.dtype(x.dtype).itemsize

    def _tile_vmem_bytes(tm_):
        acts = 3 * tm_ * widest * 4                       # f32 intermediates / acc
        xio = 2 * tm_ * c_in * x_item + 2 * tm_ * c_out * x_item
        return wb_bytes + acts + xio

    # ---- balanced batch tiles; >= 2 tiles when possible (v7x megacore) ----
    n8 = _round_up(n, 8)
    num_tiles = max(pl.cdiv(n8, tile_m_max), 2 if n8 >= 16 else 1)
    tm = _round_up(pl.cdiv(n, num_tiles), 8)
    while tm > 8 and _tile_vmem_bytes(tm) > vmem_budget_bytes:
        tm -= 8
    grid_m = pl.cdiv(n, tm)
    n_pad = grid_m * tm

    # ---- only row-pad x when needed (no lane padding, no full HBM roundtrip) ----
    x_in = x if n_pad == n else jnp.zeros((n_pad, c_in), x.dtype).at[:n, :].set(x)

    vmem_limit = int(min(max(vmem_budget_bytes, _tile_vmem_bytes(tm)),
                         128 * 1024 * 1024))

    flops = int(sum(2 * n_pad * w.shape[0] * w.shape[1] for w, _ in prepared))
    bytes_accessed = int(
        x_in.size * x_item
        + sum(int(a.size) * a.dtype.itemsize for a in flat_wb)
        + n_pad * c_out * x_item)

    # Exact f32 matmuls require precision=HIGHEST; default tolerance documented above.
    kernel = functools.partial(
        _fused_block_kernel,
        num_layers=num_layers,
        apply_act=apply_act,
        negative_slope=slope,
        precision=precision,
    )

    def _build(single_buffer):
        in_specs = [pl.BlockSpec((tm, c_in), lambda i: (i, 0))]
        for w_p, b_p in prepared:
            if single_buffer:
                # Constant blocks (index_map -> (0,0)): one buffer is enough.
                in_specs.append(pl.BlockSpec(w_p.shape, lambda i: (0, 0),
                                             pipeline_mode=pl.Buffered(1)))
                in_specs.append(pl.BlockSpec(b_p.shape, lambda i: (0, 0),
                                             pipeline_mode=pl.Buffered(1)))
            else:
                in_specs.append(pl.BlockSpec(w_p.shape, lambda i: (0, 0)))
                in_specs.append(pl.BlockSpec(b_p.shape, lambda i: (0, 0)))
        out_spec = pl.BlockSpec((tm, c_out), lambda i: (i, 0))
        return pl.pallas_call(
            kernel,
            out_shape=jax.ShapeDtypeStruct((n_pad, c_out), x.dtype),
            grid=(grid_m,),
            in_specs=in_specs,
            out_specs=out_spec,
            compiler_params=pltpu.CompilerParams(
                dimension_semantics=("parallel",),
                vmem_limit_bytes=vmem_limit),
            cost_estimate=pl.CostEstimate(
                flops=flops, transcendentals=0, bytes_accessed=bytes_accessed),
        )

    if single_buffer_weights:
        try:
            out_padded = _build(True)(x_in, *flat_wb)
        except Exception:
            # TODO(synk): pl.Buffered(1) on constant blocks unsupported on this
            # jax version; fall back to default double-buffering.
            out_padded = _build(False)(x_in, *flat_wb)
    else:
        out_padded = _build(False)(x_in, *flat_wb)

    return out_padded if n_pad == n else out_padded[:n]


def init_linear_block_params(key, layer_sizes):
    """Deterministic init mimicking PyTorch Linear default (uniform +- 1/sqrt(fan_in))."""
    params = []
    for i in range(len(layer_sizes) - 1):
        c_in, c_out = layer_sizes[i], layer_sizes[i + 1]
        key, kw, kb = jax.random.split(key, 3)
        bound = 1.0 / jnp.sqrt(jnp.float32(c_in))
        # Stored as (Cin, Cout) == W.T relative to PyTorch's (Cout, Cin).
        w = jax.random.uniform(kw, (c_in, c_out), jnp.float32, -bound, bound)
        b = jax.random.uniform(kb, (1, c_out), jnp.float32, -bound, bound)
        params.append((w, b))
    return params


def _reference_forward(x, params, *, last_linear, leaky, negative_slope=0.01):
    slope = negative_slope if leaky else 0.0
    y = x
    for i, (w, b) in enumerate(params):
        y = y @ w + b
        if not (last_linear and i == len(params) - 1):
            y = jnp.where(y >= 0.0, y, slope * y)
    return y


if __name__ == "__main__":
    # LinearBlock(32, 64, 16) with LeakyReLU(0.01) after each Linear.
    layer_sizes = (32, 64, 16)
    batch = 20   # not a multiple of the tile -> exercises row padding + 2-tile grid

    key = jax.random.PRNGKey(0)
    key_x, key_p = jax.random.split(key)
    x = jax.random.normal(key_x, (batch, layer_sizes[0]), jnp.float32)
    params = init_linear_block_params(key_p, layer_sizes)
    ref = _reference_forward(x, params, last_linear=False, leaky=True)

    # 1) f32-weight path, params prepared once and reused across calls.
    prep_f32 = prepare_linear_block_params(params, use_bf16=False)
    out_f32 = linear_block_forward(x, prep_f32, params_prepared=True,
                                   last_linear=False, leaky=True)
    out_f32 = jax.block_until_ready(out_f32)
    assert out_f32.shape == (batch, layer_sizes[-1])
    assert jnp.allclose(out_f32, ref, atol=1e-5, rtol=1e-5), (
        float(jnp.max(jnp.abs(out_f32 - ref))))

    # 2) Default bf16-operand / f32-accumulate path (pre-cast bf16 weights).
    prep_bf16 = prepare_linear_block_params(params, use_bf16=True)
    out_bf16 = linear_block_forward(x, prep_bf16, params_prepared=True,
                                    last_linear=False, leaky=True)
    out_bf16 = jax.block_until_ready(out_bf16)
    assert jnp.allclose(out_bf16, ref, atol=3e-2, rtol=3e-2), (
        float(jnp.max(jnp.abs(out_bf16 - ref))))

    # 3) last_linear=True / leaky=False (ReLU) variant, un-prepared params path.
    out_ll = linear_block_forward(x, params, last_linear=True, leaky=False,
                                  use_bf16_mxu=False)
    out_ll = jax.block_until_ready(out_ll)
    ref_ll = _reference_forward(x, params, last_linear=True, leaky=False)
    assert jnp.allclose(out_ll, ref_ll, atol=1e-5, rtol=1e-5), (
        float(jnp.max(jnp.abs(out_ll - ref_ll))))

    print("KERNEL_OK")
</pallas_src>

<mosaic_0001>
module attributes {stable_mosaic.version = 11 : i64} {
  func.func @_fused_block_kernel(%arg0: i32, %arg1: memref<16x32xf32, #tpu.memory_space<vmem>>, %arg2: memref<32x128xf32, #tpu.memory_space<vmem>>, %arg3: memref<1x128xf32, #tpu.memory_space<vmem>>, %arg4: memref<128x16xf32, #tpu.memory_space<vmem>>, %arg5: memref<1x16xf32, #tpu.memory_space<vmem>>, %arg6: memref<16x16xf32, #tpu.memory_space<vmem>>) attributes {dimension_semantics = [#tpu.dimension_semantics<parallel>], iteration_bounds = array<i64: 2>, scalar_prefetch = 0 : i64, scratch_operands = 0 : i64, tpu.core_type = #tpu.core_type<tc>, window_params = [{transform_indices = @transform_0, window_bounds = array<i64: 16, 32>}, {pipeline_mode = #tpu.pipeline_mode<synchronous>, transform_indices = @transform_1, window_bounds = array<i64: 32, 128>}, {pipeline_mode = #tpu.pipeline_mode<synchronous>, transform_indices = @transform_2, window_bounds = array<i64: 1, 128>}, {pipeline_mode = #tpu.pipeline_mode<synchronous>, transform_indices = @transform_3, window_bounds = array<i64: 128, 16>}, {pipeline_mode = #tpu.pipeline_mode<synchronous>, transform_indices = @transform_4, window_bounds = array<i64: 1, 16>}, {transform_indices = @transform_5, window_bounds = array<i64: 16, 16>}]} {
    %c0 = arith.constant 0 : index
    %c0_0 = arith.constant 0 : index
    %0 = vector.load %arg1[%c0, %c0_0] : memref<16x32xf32, #tpu.memory_space<vmem>>, vector<16x32xf32>
    %c0_1 = arith.constant 0 : index
    %c0_2 = arith.constant 0 : index
    %1 = vector.load %arg2[%c0_1, %c0_2] : memref<32x128xf32, #tpu.memory_space<vmem>>, vector<32x128xf32>
    %c0_3 = arith.constant 0 : index
    %c0_4 = arith.constant 0 : index
    %2 = vector.load %arg3[%c0_3, %c0_4] : memref<1x128xf32, #tpu.memory_space<vmem>>, vector<1x128xf32>
    %cst = arith.constant dense<0.000000e+00> : vector<16x128xf32>
    %3 = tpu.matmul %0, %1, %cst {dimension_numbers = #tpu.dot_dimension_numbers<[1], [0], [0], [1], [0, 0, 1, 1], [], []>} : vector<16x32xf32>, vector<32x128xf32>, vector<16x128xf32> -> vector<16x128xf32>
    %4 = vector.broadcast %2 : vector<1x128xf32> to vector<16x128xf32>
    %5 = arith.addf %3, %4 : vector<16x128xf32>
    %cst_5 = arith.constant 0.000000e+00 : f32
    %6 = vector.broadcast %cst_5 : f32 to vector<16x128xf32>
    %7 = arith.cmpf oge, %5, %6 : vector<16x128xf32>
    %cst_6 = arith.constant 0.00999999977 : f32
    %8 = vector.broadcast %cst_6 : f32 to vector<16x128xf32>
    %9 = arith.mulf %8, %5 : vector<16x128xf32>
    %10 = arith.select %7, %5, %9 : vector<16x128xi1>, vector<16x128xf32>
    %c0_7 = arith.constant 0 : index
    %c0_8 = arith.constant 0 : index
    %11 = vector.load %arg4[%c0_7, %c0_8] : memref<128x16xf32, #tpu.memory_space<vmem>>, vector<128x16xf32>
    %c0_9 = arith.constant 0 : index
    %c0_10 = arith.constant 0 : index
    %12 = vector.load %arg5[%c0_9, %c0_10] : memref<1x16xf32, #tpu.memory_space<vmem>>, vector<1x16xf32>
    %cst_11 = arith.constant dense<0.000000e+00> : vector<16x16xf32>
    %13 = tpu.matmul %10, %11, %cst_11 {dimension_numbers = #tpu.dot_dimension_numbers<[1], [0], [0], [1], [0, 0, 1, 1], [], []>} : vector<16x128xf32>, vector<128x16xf32>, vector<16x16xf32> -> vector<16x16xf32>
    %14 = vector.broadcast %12 : vector<1x16xf32> to vector<16x16xf32>
    %15 = arith.addf %13, %14 : vector<16x16xf32>
    %cst_12 = arith.constant 0.000000e+00 : f32
    %16 = vector.broadcast %cst_12 : f32 to vector<16x16xf32>
    %17 = arith.cmpf oge, %15, %16 : vector<16x16xf32>
    %cst_13 = arith.constant 0.00999999977 : f32
    %18 = vector.broadcast %cst_13 : f32 to vector<16x16xf32>
    %19 = arith.mulf %18, %15 : vector<16x16xf32>
    %20 = arith.select %17, %15, %19 : vector<16x16xi1>, vector<16x16xf32>
    %c0_14 = arith.constant 0 : index
    %c0_15 = arith.constant 0 : index
    %21 = vector.load %arg6[%c0_14, %c0_15] : memref<16x16xf32, #tpu.memory_space<vmem>>, vector<16x16xf32>
    tpu.vector_store %arg6[%c0_14, %c0_15], %20 {strides = array<i32>} : memref<16x16xf32, #tpu.memory_space<vmem>>, vector<16x16xf32>,
    return
  }
  func.func @transform_0(%arg0: i32) -> (i32, i32) {
    %c0_i32 = arith.constant 0 : i32
    %c0_i32_0 = arith.constant 0 : i32
    return %arg0, %c0_i32 : i32, i32
  }
  func.func @transform_1(%arg0: i32) -> (i32, i32) {
    %c0_i32 = arith.constant 0 : i32
    %c0_i32_0 = arith.constant 0 : i32
    %c0_i32_1 = arith.constant 0 : i32
    return %c0_i32, %c0_i32_0 : i32, i32
  }
  func.func @transform_2(%arg0: i32) -> (i32, i32) {
    %c0_i32 = arith.constant 0 : i32
    %c0_i32_0 = arith.constant 0 : i32
    %c0_i32_1 = arith.constant 0 : i32
    return %c0_i32, %c0_i32_0 : i32, i32
  }
  func.func @transform_3(%arg0: i32) -> (i32, i32) {
    %c0_i32 = arith.constant 0 : i32
    %c0_i32_0 = arith.constant 0 : i32
    %c0_i32_1 = arith.constant 0 : i32
    return %c0_i32, %c0_i32_0 : i32, i32
  }
  func.func @transform_4(%arg0: i32) -> (i32, i32) {
    %c0_i32 = arith.constant 0 : i32
    %c0_i32_0 = arith.constant 0 : i32
    %c0_i32_1 = arith.constant 0 : i32
    return %c0_i32, %c0_i32_0 : i32, i32
  }
  func.func @transform_5(%arg0: i32) -> (i32, i32) {
    %c0_i32 = arith.constant 0 : i32
    %c0_i32_0 = arith.constant 0 : i32
    return %arg0, %c0_i32 : i32, i32
  }
}

module attributes {stable_mosaic.version = 11 : i64} {
  func.func @_fused_block_kernel(%arg0: i32, %arg1: memref<16x32xf32, #tpu.memory_space<vmem>>, %arg2: memref<32x128xf32, #tpu.memory_space<vmem>>, %arg3: memref<1x128xf32, #tpu.memory_space<vmem>>, %arg4: memref<128x16xf32, #tpu.memory_space<vmem>>, %arg5: memref<1x16xf32, #tpu.memory_space<vmem>>, %arg6: memref<16x16xf32, #tpu.memory_space<vmem>>) attributes {dimension_semantics = [#tpu.dimension_semantics<parallel>], iteration_bounds = array<i64: 2>, scalar_prefetch = 0 : i64, scratch_operands = 0 : i64, tpu.core_type = #tpu.core_type<tc>, window_params = [{transform_indices = @transform_0, window_bounds = array<i64: 16, 32>}, {pipeline_mode = #tpu.pipeline_mode<synchronous>, transform_indices = @transform_1, window_bounds = array<i64: 32, 128>}, {pipeline_mode = #tpu.pipeline_mode<synchronous>, transform_indices = @transform_2, window_bounds = array<i64: 1, 128>}, {pipeline_mode = #tpu.pipeline_mode<synchronous>, transform_indices = @transform_3, window_bounds = array<i64: 128, 16>}, {pipeline_mode = #tpu.pipeline_mode<synchronous>, transform_indices = @transform_4, window_bounds = array<i64: 1, 16>}, {transform_indices = @transform_5, window_bounds = array<i64: 16, 16>}]} {
    %c0 = arith.constant 0 : index
    %c0_0 = arith.constant 0 : index
    %0 = vector.load %arg1[%c0, %c0_0] : memref<16x32xf32, #tpu.memory_space<vmem>>, vector<16x32xf32>
    %c0_1 = arith.constant 0 : index
    %c0_2 = arith.constant 0 : index
    %1 = vector.load %arg2[%c0_1, %c0_2] : memref<32x128xf32, #tpu.memory_space<vmem>>, vector<32x128xf32>
    %c0_3 = arith.constant 0 : index
    %c0_4 = arith.constant 0 : index
    %2 = vector.load %arg3[%c0_3, %c0_4] : memref<1x128xf32, #tpu.memory_space<vmem>>, vector<1x128xf32>
    %cst = arith.constant dense<0.000000e+00> : vector<16x128xf32>
    %3 = tpu.matmul %0, %1, %cst {dimension_numbers = #tpu.dot_dimension_numbers<[1], [0], [0], [1], [0, 0, 1, 1], [], []>} : vector<16x32xf32>, vector<32x128xf32>, vector<16x128xf32> -> vector<16x128xf32>
    %4 = vector.broadcast %2 : vector<1x128xf32> to vector<16x128xf32>
    %5 = arith.addf %3, %4 : vector<16x128xf32>
    %cst_5 = arith.constant 0.000000e+00 : f32
    %6 = vector.broadcast %cst_5 : f32 to vector<16x128xf32>
    %7 = arith.cmpf oge, %5, %6 : vector<16x128xf32>
    %cst_6 = arith.constant 0.00999999977 : f32
    %8 = vector.broadcast %cst_6 : f32 to vector<16x128xf32>
    %9 = arith.mulf %8, %5 : vector<16x128xf32>
    %10 = arith.select %7, %5, %9 : vector<16x128xi1>, vector<16x128xf32>
    %c0_7 = arith.constant 0 : index
    %c0_8 = arith.constant 0 : index
    %11 = vector.load %arg4[%c0_7, %c0_8] : memref<128x16xf32, #tpu.memory_space<vmem>>, vector<128x16xf32>
    %c0_9 = arith.constant 0 : index
    %c0_10 = arith.constant 0 : index
    %12 = vector.load %arg5[%c0_9, %c0_10] : memref<1x16xf32, #tpu.memory_space<vmem>>, vector<1x16xf32>
    %cst_11 = arith.constant dense<0.000000e+00> : vector<16x16xf32>
    %13 = tpu.matmul %10, %11, %cst_11 {dimension_numbers = #tpu.dot_dimension_numbers<[1], [0], [0], [1], [0, 0, 1, 1], [], []>} : vector<16x128xf32>, vector<128x16xf32>, vector<16x16xf32> -> vector<16x16xf32>
    %14 = vector.broadcast %12 : vector<1x16xf32> to vector<16x16xf32>
    %15 = arith.addf %13, %14 : vector<16x16xf32>
    %cst_12 = arith.constant 0.000000e+00 : f32
    %16 = vector.broadcast %cst_12 : f32 to vector<16x16xf32>
    %17 = arith.cmpf oge, %15, %16 : vector<16x16xf32>
    %cst_13 = arith.constant 0.00999999977 : f32
    %18 = vector.broadcast %cst_13 : f32 to vector<16x16xf32>
    %19 = arith.mulf %18, %15 : vector<16x16xf32>
    %20 = arith.select %17, %15, %19 : vector<16x16xi1>, vector<16x16xf32>
    %c0_14 = arith.constant 0 : index
    %c0_15 = arith.constant 0 : index
    %21 = vector.load %arg6[%c0_14, %c0_15] : memref<16x16xf32, #tpu.memory_space<vmem>>, vector<16x16xf32>
    tpu.vector_store %arg6[%c0_14, %c0_15], %20 {strides = array<i32>} : memref<16x16xf32, #tpu.memory_space<vmem>>, vector<16x16xf32>,
    return
  }
  func.func @transform_0(%arg0: i32) -> (i32, i32) {
    %c0_i32 = arith.constant 0 : i32
    %c0_i32_0 = arith.constant 0 : i32
    return %arg0, %c0_i32 : i32, i32
  }
  func.func @transform_1(%arg0: i32) -> (i32, i32) {
    %c0_i32 = arith.constant 0 : i32
    %c0_i32_0 = arith.constant 0 : i32
    %c0_i32_1 = arith.constant 0 : i32
    return %c0_i32, %c0_i32_0 : i32, i32
  }
  func.func @transform_2(%arg0: i32) -> (i32, i32) {
    %c0_i32 = arith.constant 0 : i32
    %c0_i32_0 = arith.constant 0 : i32
    %c0_i32_1 = arith.constant 0 : i32
    return %c0_i32, %c0_i32_0 : i32, i32
  }
  func.func @transform_3(%arg0: i32) -> (i32, i32) {
    %c0_i32 = arith.constant 0 : i32
    %c0_i32_0 = arith.constant 0 : i32
    %c0_i32_1 = arith.constant 0 : i32
    return %c0_i32, %c0_i32_0 : i32, i32
  }
  func.func @transform_4(%arg0: i32) -> (i32, i32) {
    %c0_i32 = arith.constant 0 : i32
    %c0_i32_0 = arith.constant 0 : i32
    %c0_i32_1 = arith.constant 0 : i32
    return %c0_i32, %c0_i32_0 : i32, i32
  }
  func.func @transform_5(%arg0: i32) -> (i32, i32) {
    %c0_i32 = arith.constant 0 : i32
    %c0_i32_0 = arith.constant 0 : i32
    return %arg0, %c0_i32 : i32, i32
  }
}

</mosaic_0001>

<bundles_post_ra>
// kernel: tpu_custom_call.1
= control target key start
LH: loop header
LB: loop body
LE: loop exit
PB: predicated region body
PF: predicated region fallthrough
CT: control target
= control target key end

     0   :  { %s623_s18 = smov 0   ;;  %s713_s0 = inlined_call_operand.vmem [shape: f32[32,32], index: 0, kind: input, shape index: {}]   ;;  %s714_s1 = inlined_call_operand.vmem [shape: f32[32,128], index: 1, kind: input, shape index: {}]   ;;  %s715_s2 = inlined_call_operand.vmem [shape: f32[1,128], index: 2, kind: input, shape index: {}]   ;;  %s716_s3 = inlined_call_operand.vmem [shape: f32[128,16], index: 3, kind: input, shape index: {}]   ;;  %s717_s4 = inlined_call_operand.vmem [shape: f32[1,16], index: 4, kind: input, shape index: {}]   ;;  %s718_s5 = inlined_call_operand.vmem [shape: f32[32,16], index: 5, kind: output, shape index: {}]  }
   0x1 LB: > { %s492_s19 = sadd.s32 4294967295, %s591_s18   ;;  %p496_p0 = scmp.ge.s32.totalorder %s591_s18, 1  ;;  %s591_s18 = sphi %s623_s18, %s15_s18  }
   0x2   : > { %p188_p1 = scmp.lt.s32.totalorder %s591_s18, 3 }
   0x4   : > { %p189_p2 = pnand %p496_p0, %p188_p1 }
   0x5   : > { %s497_s24 = sshll.u32 (!%p189_p2), %s492_s19, 1 }
   0x6   : > { %192 = sbr.rel (%p189_p2) target bundleno = 422 (0x1a6), region = 40  ;;  %p217_p3 = scmp.lt.s32.totalorder (!%p189_p2), %s497_s24, 3 }
   0xb   : > { %v233_v0 = vld [vmem:[%s714_s1 + $0x18] sm:$0xff]  ;;  %v232_v1 = vld [vmem:[%s714_s1 + $0x10] sm:$0xff]  ;;  %v231_v4 = vld [vmem:[%s714_s1 + $0x8] sm:$0xff]  ;;  %s720_s24 = smov (!%p217_p3, %s497_s24), 3  ;;  %vm241_vm0 = vcmask 261120   ;;  %vm433_vm5 = vcmask 130048  }
   0xc   : > { %531 = vmatprep.subr.mxu0 %v233_v0  ;;  %v344_v2 = vld [vmem:[%s716_s3 + $0x78] sm:$0xff]  ;;  %v343_v3 = vld [vmem:[%s716_s3 + $0x70] sm:$0xff]  ;;  %v342_v5 = vld [vmem:[%s716_s3 + $0x68] sm:$0xff]  ;;  %s498_s10 = sshll.u32 %s720_s24, 3 }
   0xd   : > { %532 = vmatpush3.msra.mxu0 %v233_v0  ;;  %542 = vmatprep.subr.mxu1 %v344_v2  ;;  %v230_v6 = vld [vmem:[%s714_s1] sm:$0xff]  ;;  %s220_s13 = scalar_lea.vmem %s713_s0, %s498_s10  ;;  %v340_v10 = vld [vmem:[%s716_s3 + $0x58] sm:$0xff]  ;;  %v339_v11 = vld [vmem:[%s716_s3 + $0x50] sm:$0xff]  ;;  %s226_s26 = scalar_lea.vmem %s718_s5, %s498_s10 }
   0xe   : > { %533 = vmatprep.subr.mxu0 %v232_v1  ;;  %543 = vmatpush3.msra.mxu1 %v344_v2  ;;  %v341_v7 = vld [vmem:[%s716_s3 + $0x60] sm:$0xff]  ;;  %v229_v9 = vld [vmem:[%s220_s13 + $0x8] sm:$0xff]  ;;  %v336_v14 = vld [vmem:[%s716_s3 + $0x38] sm:$0xff] }
   0xf   : > { %534 = vmatpush3.msra.mxu0 %v232_v1  ;;  %544 = vmatprep.subr.mxu1 %v343_v3  ;;  %v228_v8 = vld [vmem:[%s220_s13] sm:$0xff]  ;;  %v338_v12 = vld [vmem:[%s716_s3 + $0x48] sm:$0xff]  ;;  %v335_v15 = vld [vmem:[%s716_s3 + $0x30] sm:$0xff] }
  0x10   : > { %535 = vmatprep.subr.mxu0 %v231_v4  ;;  %545 = vmatpush3.msra.mxu1 %v343_v3  ;;  %v337_v13 = vld [vmem:[%s716_s3 + $0x40] sm:$0xff]  ;;  %v334_v16 = vld [vmem:[%s716_s3 + $0x28] sm:$0xff]  ;;  %v332_v18 = vld [vmem:[%s716_s3 + $0x18] sm:$0xff] }
  0x11   : > { %536 = vmatpush3.msra.mxu0 %v231_v4  ;;  %546 = vmatprep.subr.mxu1 %v342_v5  ;;  %v333_v17 = vld [vmem:[%s716_s3 + $0x20] sm:$0xff]  ;;  %v331_v19 = vld [vmem:[%s716_s3 + $0x10] sm:$0xff]  ;;  %v330_v20 = vld [vmem:[%s716_s3 + $0x8] sm:$0xff] }
  0x12   : > { %537 = vmatprep.subr.mxu0 %v230_v6  ;;  %547 = vmatpush3.msra.mxu1 %v342_v5  ;;  %v329_v21 = vld [vmem:[%s716_s3] sm:$0xff] }
  0x13   : > { %538 = vmatpush3.msra.mxu0 %v230_v6  ;;  %539 = vmatprep.mubr.msk.f32.mxu0 %vm241_vm0, %v228_v8  ;;  %v501_v22 = vld [vmem:[%s715_s2] ss:$0 sm:$0xff] }
  0x14   : > { %540 = vmatmul.mubr.msk.f32.vlgmr.msra.gmra.mxu0 %vm241_vm0, %v229_v9  ;;  %548 = vmatprep.subr.mxu1 %v341_v7  ;;  %v504_v31 = vld [vmem:[%s717_s4] ss:$0 sm:$0xff] }
  0x15   : > { %549 = vmatpush3.msra.mxu1 %v341_v7 }
  0x16   : > { %550 = vmatprep.subr.mxu1 %v340_v10 }
  0x17   : > { %551 = vmatpush3.msra.mxu1 %v340_v10 }
  0x18   : > { %552 = vmatprep.subr.mxu1 %v339_v11 }
  0x19   : > { %553 = vmatpush3.msra.mxu1 %v339_v11 }
  0x1a   : > { %554 = vmatprep.subr.mxu1 %v338_v12 }
  0x1b   : > { %555 = vmatpush3.msra.mxu1 %v338_v12 }
  0x1c   : > { %556 = vmatprep.subr.mxu1 %v337_v13 }
  0x1d   : > { %557 = vmatpush3.msra.mxu1 %v337_v13 }
  0x1e   : > { %558 = vmatprep.subr.mxu1 %v336_v14 }
  0x1f   : > { %559 = vmatpush3.msra.mxu1 %v336_v14 }
  0x20   : > { %560 = vmatprep.subr.mxu1 %v335_v15 }
  0x21   : > { %561 = vmatpush3.msra.mxu1 %v335_v15 }
  0x22   : > { %562 = vmatprep.subr.mxu1 %v334_v16 }
  0x23   : > { %563 = vmatpush3.msra.mxu1 %v334_v16 }
  0x24   : > { %564 = vmatprep.subr.mxu1 %v333_v17 }
  0x25   : > { %565 = vmatpush3.msra.mxu1 %v333_v17 }
  0x26   : > { %566 = vmatprep.subr.mxu1 %v332_v18 }
  0x27   : > { %567 = vmatpush3.msra.mxu1 %v332_v18 }
  0x28   : > { %568 = vmatprep.subr.mxu1 %v331_v19 }
  0x29   : > { %569 = vmatpush3.msra.mxu1 %v331_v19 }
  0x2a   : > { %570 = vmatprep.subr.mxu1 %v330_v20 }
  0x2b   : > { %571 = vmatpush3.msra.mxu1 %v330_v20 }
  0x2c   : > { %572 = vmatprep.subr.mxu1 %v329_v21 }
  0x2d   : > { %573 = vmatpush3.msra.mxu1 %v329_v21 }
  0xd4   : > { %v541_v23 = vpop.f32.mrf.mxu0 }
  0xd5   : > { %v320_v24 = vadd.f32 %v541_v23, %v501_v22 }
  0xd6   : > { %v314_v25 = vpop.f32.mrf.mxu0 }
  0xd7   : > { %v315_v26 = vadd.f32 %v501_v22, %v314_v25  ;;  %v326_v27 = vmul.f32 0.01, %v320_v24  ;;  %vm324_vm2 = vcmp.ge.f32.partialorder %v320_v24, 0.0 }
  0xd9   : > { %vm323_vm1 = vcmp.ge.f32.partialorder %v315_v26, 0.0  ;;  %v325_v28 = vmul.f32 0.01, %v315_v26  ;;  %v328_v30 = vsel %vm324_vm2, %v320_v24, %v326_v27 }
  0xdb   : > { %v327_v29 = vsel %vm323_vm1, %v315_v26, %v325_v28 }
  0xdc   : > { %574 = vmatprep.mubr.f32.mxu1 %v327_v29 }
  0xdd   : > { %575 = vmatmul.mubr.f32.vlgmr.msra.gmra.mxu1 %v328_v30 }
 0x19d   : > { %v576_v32 = vpop.f32.mrf.mxu1 }
 0x19e   : > { %v424_v33 = vadd.f32 %v576_v32, %v504_v31 }
 0x19f   : > { %v418_v34 = vpop.f32.mrf.mxu1 }
 0x1a0   : > { %v419_v35 = vadd.f32 %v504_v31, %v418_v34  ;;  %v430_v36 = vmul.f32 0.01, %v424_v33  ;;  %vm428_vm3 = vcmp.ge.f32.partialorder %v424_v33, 0.0 }
 0x1a2   : > { %vm427_vm4 = vcmp.ge.f32.partialorder %v419_v35, 0.0  ;;  %v429_v37 = vmul.f32 0.01, %v419_v35  ;;  %v432_v39 = vsel %vm428_vm3, %v424_v33, %v430_v36 }
 0x1a3   : > { %435 = vst.msk [vmem:[%s226_s26 + $0x8] sm:$0xff] %vm433_vm5, %v432_v39 }
 0x1a4   : > { %v431_v38 = vsel %vm427_vm4, %v419_v35, %v429_v37 }
 0x1a5   : > { %434 = vst.msk [vmem:[%s226_s26] sm:$0xff] %vm433_vm5, %v431_v38 }
 0x1a6 PF: > { %s15_s18 = sadd.s32 1, %s591_s18  }
 0x1a7   : > { %p12_p4 = scmp.ge.s32.totalorder %s15_s18, 4  }
 0x1a9   :  { %14 = sbr.rel (!%p12_p4) target bundleno = 1 (0x1), region = 70 }

// kernel: tpu_custom_call.1
= control target key start
LH: loop header
LB: loop body
LE: loop exit
PB: predicated region body
PF: predicated region fallthrough
CT: control target
= control target key end

     0   :  { %s623_s18 = smov 0   ;;  %s713_s0 = inlined_call_operand.vmem [shape: f32[32,32], index: 0, kind: input, shape index: {}]   ;;  %s714_s1 = inlined_call_operand.vmem [shape: f32[32,128], index: 1, kind: input, shape index: {}]   ;;  %s715_s2 = inlined_call_operand.vmem [shape: f32[1,128], index: 2, kind: input, shape index: {}]   ;;  %s716_s3 = inlined_call_operand.vmem [shape: f32[128,16], index: 3, kind: input, shape index: {}]   ;;  %s717_s4 = inlined_call_operand.vmem [shape: f32[1,16], index: 4, kind: input, shape index: {}]   ;;  %s718_s5 = inlined_call_operand.vmem [shape: f32[32,16], index: 5, kind: output, shape index: {}]  }
   0x1 LB: > { %s492_s19 = sadd.s32 4294967295, %s591_s18   ;;  %p496_p0 = scmp.ge.s32.totalorder %s591_s18, 1  ;;  %s591_s18 = sphi %s623_s18, %s15_s18  }
   0x2   : > { %p188_p1 = scmp.lt.s32.totalorder %s591_s18, 3 }
   0x4   : > { %p189_p2 = pnand %p496_p0, %p188_p1 }
   0x5   : > { %s497_s24 = sshll.u32 (!%p189_p2), %s492_s19, 1 }
   0x6   : > { %192 = sbr.rel (%p189_p2) target bundleno = 422 (0x1a6), region = 40  ;;  %p217_p3 = scmp.lt.s32.totalorder (!%p189_p2), %s497_s24, 3 }
   0xb   : > { %v233_v0 = vld [vmem:[%s714_s1 + $0x18] sm:$0xff]  ;;  %v232_v1 = vld [vmem:[%s714_s1 + $0x10] sm:$0xff]  ;;  %v231_v4 = vld [vmem:[%s714_s1 + $0x8] sm:$0xff]  ;;  %s720_s24 = smov (!%p217_p3, %s497_s24), 3  ;;  %vm241_vm0 = vcmask 261120   ;;  %vm433_vm5 = vcmask 130048  }
   0xc   : > { %531 = vmatprep.subr.mxu0 %v233_v0  ;;  %v344_v2 = vld [vmem:[%s716_s3 + $0x78] sm:$0xff]  ;;  %v343_v3 = vld [vmem:[%s716_s3 + $0x70] sm:$0xff]  ;;  %v342_v5 = vld [vmem:[%s716_s3 + $0x68] sm:$0xff]  ;;  %s498_s10 = sshll.u32 %s720_s24, 3 }
   0xd   : > { %532 = vmatpush3.msra.mxu0 %v233_v0  ;;  %542 = vmatprep.subr.mxu1 %v344_v2  ;;  %v230_v6 = vld [vmem:[%s714_s1] sm:$0xff]  ;;  %s220_s13 = scalar_lea.vmem %s713_s0, %s498_s10  ;;  %v340_v10 = vld [vmem:[%s716_s3 + $0x58] sm:$0xff]  ;;  %v339_v11 = vld [vmem:[%s716_s3 + $0x50] sm:$0xff]  ;;  %s226_s26 = scalar_lea.vmem %s718_s5, %s498_s10 }
   0xe   : > { %533 = vmatprep.subr.mxu0 %v232_v1  ;;  %543 = vmatpush3.msra.mxu1 %v344_v2  ;;  %v341_v7 = vld [vmem:[%s716_s3 + $0x60] sm:$0xff]  ;;  %v229_v9 = vld [vmem:[%s220_s13 + $0x8] sm:$0xff]  ;;  %v336_v14 = vld [vmem:[%s716_s3 + $0x38] sm:$0xff] }
   0xf   : > { %534 = vmatpush3.msra.mxu0 %v232_v1  ;;  %544 = vmatprep.subr.mxu1 %v343_v3  ;;  %v228_v8 = vld [vmem:[%s220_s13] sm:$0xff]  ;;  %v338_v12 = vld [vmem:[%s716_s3 + $0x48] sm:$0xff]  ;;  %v335_v15 = vld [vmem:[%s716_s3 + $0x30] sm:$0xff] }
  0x10   : > { %535 = vmatprep.subr.mxu0 %v231_v4  ;;  %545 = vmatpush3.msra.mxu1 %v343_v3  ;;  %v337_v13 = vld [vmem:[%s716_s3 + $0x40] sm:$0xff]  ;;  %v334_v16 = vld [vmem:[%s716_s3 + $0x28] sm:$0xff]  ;;  %v332_v18 = vld [vmem:[%s716_s3 + $0x18] sm:$0xff] }
  0x11   : > { %536 = vmatpush3.msra.mxu0 %v231_v4  ;;  %546 = vmatprep.subr.mxu1 %v342_v5  ;;  %v333_v17 = vld [vmem:[%s716_s3 + $0x20] sm:$0xff]  ;;  %v331_v19 = vld [vmem:[%s716_s3 + $0x10] sm:$0xff]  ;;  %v330_v20 = vld [vmem:[%s716_s3 + $0x8] sm:$0xff] }
  0x12   : > { %537 = vmatprep.subr.mxu0 %v230_v6  ;;  %547 = vmatpush3.msra.mxu1 %v342_v5  ;;  %v329_v21 = vld [vmem:[%s716_s3] sm:$0xff] }
  0x13   : > { %538 = vmatpush3.msra.mxu0 %v230_v6  ;;  %539 = vmatprep.mubr.msk.f32.mxu0 %vm241_vm0, %v228_v8  ;;  %v501_v22 = vld [vmem:[%s715_s2] ss:$0 sm:$0xff] }
  0x14   : > { %540 = vmatmul.mubr.msk.f32.vlgmr.msra.gmra.mxu0 %vm241_vm0, %v229_v9  ;;  %548 = vmatprep.subr.mxu1 %v341_v7  ;;  %v504_v31 = vld [vmem:[%s717_s4] ss:$0 sm:$0xff] }
  0x15   : > { %549 = vmatpush3.msra.mxu1 %v341_v7 }
  0x16   : > { %550 = vmatprep.subr.mxu1 %v340_v10 }
  0x17   : > { %551 = vmatpush3.msra.mxu1 %v340_v10 }
  0x18   : > { %552 = vmatprep.subr.mxu1 %v339_v11 }
  0x19   : > { %553 = vmatpush3.msra.mxu1 %v339_v11 }
  0x1a   : > { %554 = vmatprep.subr.mxu1 %v338_v12 }
  0x1b   : > { %555 = vmatpush3.msra.mxu1 %v338_v12 }
  0x1c   : > { %556 = vmatprep.subr.mxu1 %v337_v13 }
  0x1d   : > { %557 = vmatpush3.msra.mxu1 %v337_v13 }
  0x1e   : > { %558 = vmatprep.subr.mxu1 %v336_v14 }
  0x1f   : > { %559 = vmatpush3.msra.mxu1 %v336_v14 }
  0x20   : > { %560 = vmatprep.subr.mxu1 %v335_v15 }
  0x21   : > { %561 = vmatpush3.msra.mxu1 %v335_v15 }
  0x22   : > { %562 = vmatprep.subr.mxu1 %v334_v16 }
  0x23   : > { %563 = vmatpush3.msra.mxu1 %v334_v16 }
  0x24   : > { %564 = vmatprep.subr.mxu1 %v333_v17 }
  0x25   : > { %565 = vmatpush3.msra.mxu1 %v333_v17 }
  0x26   : > { %566 = vmatprep.subr.mxu1 %v332_v18 }
  0x27   : > { %567 = vmatpush3.msra.mxu1 %v332_v18 }
  0x28   : > { %568 = vmatprep.subr.mxu1 %v331_v19 }
  0x29   : > { %569 = vmatpush3.msra.mxu1 %v331_v19 }
  0x2a   : > { %570 = vmatprep.subr.mxu1 %v330_v20 }
  0x2b   : > { %571 = vmatpush3.msra.mxu1 %v330_v20 }
  0x2c   : > { %572 = vmatprep.subr.mxu1 %v329_v21 }
  0x2d   : > { %573 = vmatpush3.msra.mxu1 %v329_v21 }
  0xd4   : > { %v541_v23 = vpop.f32.mrf.mxu0 }
  0xd5   : > { %v320_v24 = vadd.f32 %v541_v23, %v501_v22 }
  0xd6   : > { %v314_v25 = vpop.f32.mrf.mxu0 }
  0xd7   : > { %v315_v26 = vadd.f32 %v501_v22, %v314_v25  ;;  %v326_v27 = vmul.f32 0.01, %v320_v24  ;;  %vm324_vm2 = vcmp.ge.f32.partialorder %v320_v24, 0.0 }
  0xd9   : > { %vm323_vm1 = vcmp.ge.f32.partialorder %v315_v26, 0.0  ;;  %v325_v28 = vmul.f32 0.01, %v315_v26  ;;  %v328_v30 = vsel %vm324_vm2, %v320_v24, %v326_v27 }
  0xdb   : > { %v327_v29 = vsel %vm323_vm1, %v315_v26, %v325_v28 }
  0xdc   : > { %574 = vmatprep.mubr.f32.mxu1 %v327_v29 }
  0xdd   : > { %575 = vmatmul.mubr.f32.vlgmr.msra.gmra.mxu1 %v328_v30 }
 0x19d   : > { %v576_v32 = vpop.f32.mrf.mxu1 }
 0x19e   : > { %v424_v33 = vadd.f32 %v576_v32, %v504_v31 }
 0x19f   : > { %v418_v34 = vpop.f32.mrf.mxu1 }
 0x1a0   : > { %v419_v35 = vadd.f32 %v504_v31, %v418_v34  ;;  %v430_v36 = vmul.f32 0.01, %v424_v33  ;;  %vm428_vm3 = vcmp.ge.f32.partialorder %v424_v33, 0.0 }
 0x1a2   : > { %vm427_vm4 = vcmp.ge.f32.partialorder %v419_v35, 0.0  ;;  %v429_v37 = vmul.f32 0.01, %v419_v35  ;;  %v432_v39 = vsel %vm428_vm3, %v424_v33, %v430_v36 }
 0x1a3   : > { %435 = vst.msk [vmem:[%s226_s26 + $0x8] sm:$0xff] %vm433_vm5, %v432_v39 }
 0x1a4   : > { %v431_v38 = vsel %vm427_vm4, %v419_v35, %v429_v37 }
 0x1a5   : > { %434 = vst.msk [vmem:[%s226_s26] sm:$0xff] %vm433_vm5, %v431_v38 }
 0x1a6 PF: > { %s15_s18 = sadd.s32 1, %s591_s18  }
 0x1a7   : > { %p12_p4 = scmp.ge.s32.totalorder %s15_s18, 4  }
 0x1a9   :  { %14 = sbr.rel (!%p12_p4) target bundleno = 1 (0x1), region = 70 }

</bundles_post_ra>
